<compile_context>
chip_gen: v7x
topology: tpu7x:2x2x1
jax: 0.10.0
libtpu: 0.0.40
codegen_flags: <defaults>
</compile_context>

<pallas_src>
import jax
import jax.numpy as jnp
import numpy as np
from jax.experimental import pallas as pl
from jax.experimental.pallas import tpu as pltpu


def _time_encode_kernel(ts_ref, wf_ref, out_ref):
    # ts_ref : (TILE_R, K)     f32  -- PACK packed timestamps, a ones bias
    #                                  column, zero padding up to K (mult of 8)
    # wf_ref : (K, LANES)      f32  -- group-masked tiled freqs, tiled phase
    #                                  row, zero padding rows
    # out_ref: (TILE_R, LANES) out dtype
    # Offload the lane broadcast + phase bias to the otherwise-idle MXU; the
    # VALU slot only runs the cos polynomial.  HIGHEST precision is required:
    # default f32 dot truncates toward bf16 and ts*freq can be O(100).
    acc = jnp.dot(ts_ref[...], wf_ref[...],
                  preferred_element_type=jnp.float32,
                  precision=jax.lax.Precision.HIGHEST)
    out_ref[...] = jnp.cos(acc).astype(out_ref.dtype)


def _round_up(x, m):
    return ((x + m - 1) // m) * m


def time_encode(ts, basis_freq, phase, *, out_dtype=jnp.float32,
                max_tile_rows=8192, min_grid_steps=4):
    """ts: (B, L) float -> (B, L, D) float, D = basis_freq.shape[0]."""
    B, L = ts.shape
    D = int(basis_freq.shape[0])
    N = B * L

    # ---- lane-packing factor ------------------------------------------------
    pack_full = (128 // D) if (D <= 128 and 128 % D == 0) else 1
    # Largest divisor of pack_full that also divides N: removes any need for
    # padding and the post-kernel slice (which would cost a full extra HBM pass
    # over the output).  When pack < pack_full the output stores are narrower
    # than 128 lanes; arrange B*L % (128 // D) == 0 at call sites for the
    # fully lane-dense fast path.
    pack = next(p for p in range(pack_full, 0, -1)
                if pack_full % p == 0 and N % p == 0)
    lanes = pack * D
    K = _round_up(pack + 1, 8)          # + ones bias col, padded to mult of 8

    f32 = jnp.float32
    freq_f32 = basis_freq.astype(f32)
    phase_f32 = phase.astype(f32)

    # Constant weight table (K, lanes):
    #   row p < pack : freq[l % D] if l // D == p else 0
    #   row pack     : phase[l % D]   (bias row, hit by the ones column)
    #   rows > pack  : 0              (alignment padding)
    freq_row = jnp.tile(freq_f32, pack)[None, :]                        # (1, lanes)
    group_mask = (np.arange(lanes)[None, :] // D
                  == np.arange(pack)[:, None]).astype(np.float32)       # (pack, lanes)
    wf_rows = [freq_row * jnp.asarray(group_mask),
               jnp.tile(phase_f32, pack)[None, :]]
    if K > pack + 1:
        wf_rows.append(jnp.zeros((K - pack - 1, lanes), f32))
    wf = jnp.concatenate(wf_rows, axis=0)                               # (K, lanes)

    # Pack ts rows, append ones bias column and zero alignment padding.
    R = N // pack
    ts_packed = ts.reshape(R, pack).astype(f32)
    ts_cols = [ts_packed, jnp.ones((R, 1), f32)]
    if K > pack + 1:
        ts_cols.append(jnp.zeros((R, K - pack - 1), f32))
    ts_aug = jnp.concatenate(ts_cols, axis=1)                           # (R, K)

    # ---- row tiling -----------------------------------------------------------
    out_itemsize = jnp.dtype(out_dtype).itemsize
    row_align = 16 if out_itemsize < 4 else 8        # sublane constraint
    max_tile_rows = max(row_align, (max_tile_rows // row_align) * row_align)

    # Per-row VMEM cost of one pipelined step (lane-padded ts + out, x2 buffers).
    ts_row_b = _round_up(K, 128) * 4
    out_row_b = _round_up(lanes, 128) * out_itemsize
    per_row_vmem = 2 * (ts_row_b + out_row_b)

    if R <= 2 * row_align:
        tile_r = R                                   # single full-extent block
    else:
        # >= min_grid_steps steps: DMA/compute double-buffering and enough
        # grid steps for v7x's second TensorCore; blocks as large as the VMEM
        # budget comfortably allows (<= ~40 MiB double-buffered footprint).
        tile_r = min(max_tile_rows,
                     _round_up(pl.cdiv(R, min_grid_steps), row_align))
        rows_by_vmem = max(row_align,
                           ((40 << 20) // per_row_vmem) // row_align * row_align)
        tile_r = min(tile_r, rows_by_vmem)
    grid = (pl.cdiv(R, tile_r),)

    vmem_needed = tile_r * per_row_vmem + (2 << 20)
    vmem_limit = int(min(max(vmem_needed, 16 << 20), 48 << 20))

    out_packed = pl.pallas_call(
        _time_encode_kernel,
        out_shape=jax.ShapeDtypeStruct((R, lanes), out_dtype),
        grid=grid,
        in_specs=[
            pl.BlockSpec((tile_r, K), lambda i: (i, 0)),
            pl.BlockSpec((K, lanes), lambda i: (0, 0)),
        ],
        out_specs=pl.BlockSpec((tile_r, lanes), lambda i: (i, 0)),
        compiler_params=pltpu.CompilerParams(
            dimension_semantics=("parallel",),
            vmem_limit_bytes=vmem_limit),
    )(ts_aug, wf)

    # (R, lanes) row-major is identical to (N, D) row-major -> free reshape.
    return out_packed.reshape(B, L, D)


if __name__ == "__main__":
    def make_params(expand_dim, phase_zero=True, key=None):
        # Deterministic init exactly as TimeEncode.__init__:
        #   basis_freq = 1 / 10 ** linspace(0, 9, D), phase = zeros(D)
        basis_freq = jnp.asarray(1.0 / (10.0 ** np.linspace(0, 9, expand_dim)),
                                 dtype=jnp.float32)
        if phase_zero:
            phase = jnp.zeros((expand_dim,), dtype=jnp.float32)
        else:
            phase = jax.random.uniform(key, (expand_dim,), dtype=jnp.float32)
        return basis_freq, phase

    def reference(ts, basis_freq, phase):
        # Same semantics as the PyTorch forward, plain JAX (same cos impl).
        return np.asarray(jnp.cos(ts[:, :, None] * basis_freq[None, None, :]
                                  + phase[None, None, :]), np.float64)

    key = jax.random.PRNGKey(0)

    # 1) Module-default config: expand_dim=32, batch=2, seq_len=8, phase=0.
    D, B, L = 32, 2, 8
    basis_freq, phase = make_params(D)
    k1, key = jax.random.split(key)
    ts = jax.random.uniform(k1, (B, L), dtype=jnp.float32) * 100.0
    out = jax.block_until_ready(time_encode(ts, basis_freq, phase))
    assert out.shape == (B, L, D)
    np.testing.assert_allclose(np.asarray(out, np.float64),
                               reference(ts, basis_freq, phase),
                               rtol=1e-4, atol=1e-4)

    # 2) Multi-step grid + non-zero phase (exercises the MXU-folded bias).
    D, B, L = 32, 4, 64
    k1, k2, key = jax.random.split(key, 3)
    basis_freq, phase = make_params(D, phase_zero=False, key=k2)
    ts = jax.random.uniform(k1, (B, L), dtype=jnp.float32) * 100.0
    out = jax.block_until_ready(time_encode(ts, basis_freq, phase))
    np.testing.assert_allclose(np.asarray(out, np.float64),
                               reference(ts, basis_freq, phase),
                               rtol=1e-4, atol=1e-4)

    # 3) bf16 output (halves HBM writeback on bandwidth-poor chips).
    out_bf16 = jax.block_until_ready(
        time_encode(ts, basis_freq, phase, out_dtype=jnp.bfloat16))
    np.testing.assert_allclose(np.asarray(out_bf16, np.float64),
                               reference(ts, basis_freq, phase),
                               rtol=0.0, atol=2e-2)

    # 4) Fallback path: B*L not a multiple of 128 // D (narrower stores, no pad).
    D, B, L = 32, 3, 5
    k1, key = jax.random.split(key)
    basis_freq, phase = make_params(D)
    ts = jax.random.uniform(k1, (B, L), dtype=jnp.float32) * 100.0
    out = jax.block_until_ready(time_encode(ts, basis_freq, phase))
    np.testing.assert_allclose(np.asarray(out, np.float64),
                               reference(ts, basis_freq, phase),
                               rtol=1e-4, atol=1e-4)

    print("KERNEL_OK")
</pallas_src>

<mosaic_0001>
module attributes {stable_mosaic.version = 11 : i64} {
  func.func @_time_encode_kernel(%arg0: i32, %arg1: memref<4x8xf32, #tpu.memory_space<vmem>>, %arg2: memref<8x128xf32, #tpu.memory_space<vmem>>, %arg3: memref<4x128xf32, #tpu.memory_space<vmem>>) attributes {dimension_semantics = [#tpu.dimension_semantics<parallel>], iteration_bounds = array<i64: 1>, scalar_prefetch = 0 : i64, scratch_operands = 0 : i64, tpu.core_type = #tpu.core_type<tc>, window_params = [{transform_indices = @transform_0, window_bounds = array<i64: 4, 8>}, {pipeline_mode = #tpu.pipeline_mode<synchronous>, transform_indices = @transform_1, window_bounds = array<i64: 8, 128>}, {transform_indices = @transform_2, window_bounds = array<i64: 4, 128>}]} {
    %c0 = arith.constant 0 : index
    %c0_0 = arith.constant 0 : index
    %0 = vector.load %arg1[%c0, %c0_0] : memref<4x8xf32, #tpu.memory_space<vmem>>, vector<4x8xf32>
    %c0_1 = arith.constant 0 : index
    %c0_2 = arith.constant 0 : index
    %1 = vector.load %arg2[%c0_1, %c0_2] : memref<8x128xf32, #tpu.memory_space<vmem>>, vector<8x128xf32>
    %cst = arith.constant dense<0.000000e+00> : vector<4x128xf32>
    %2 = tpu.matmul %0, %1, %cst {dimension_numbers = #tpu.dot_dimension_numbers<[1], [0], [0], [1], [0, 0, 1, 1], [], []>, precision = #tpu.contract_precision<fp32>} : vector<4x8xf32>, vector<8x128xf32>, vector<4x128xf32> -> vector<4x128xf32>
    %3 = math.cos %2 : vector<4x128xf32>
    %c0_3 = arith.constant 0 : index
    %c0_4 = arith.constant 0 : index
    %4 = vector.load %arg3[%c0_3, %c0_4] : memref<4x128xf32, #tpu.memory_space<vmem>>, vector<4x128xf32>
    tpu.vector_store %arg3[%c0_3, %c0_4], %3 {strides = array<i32>} : memref<4x128xf32, #tpu.memory_space<vmem>>, vector<4x128xf32>,
    return
  }
  func.func @transform_0(%arg0: i32) -> (i32, i32) {
    %c0_i32 = arith.constant 0 : i32
    %c0_i32_0 = arith.constant 0 : i32
    return %arg0, %c0_i32 : i32, i32
  }
  func.func @transform_1(%arg0: i32) -> (i32, i32) {
    %c0_i32 = arith.constant 0 : i32
    %c0_i32_0 = arith.constant 0 : i32
    %c0_i32_1 = arith.constant 0 : i32
    return %c0_i32, %c0_i32_0 : i32, i32
  }
  func.func @transform_2(%arg0: i32) -> (i32, i32) {
    %c0_i32 = arith.constant 0 : i32
    %c0_i32_0 = arith.constant 0 : i32
    return %arg0, %c0_i32 : i32, i32
  }
}

</mosaic_0001>

<bundles_post_ra>
// kernel: tpu_custom_call.1
= control target key start
LH: loop header
LB: loop body
LE: loop exit
PB: predicated region body
PF: predicated region fallthrough
CT: control target
= control target key end

     0   :  { %7 = vsyncpa [#allocation3], 0  ;;  %s843_s0 = inlined_call_operand.hbm [shape: f32[4,8], index: 0, kind: input, shape index: {}]   ;;  %s844_s1 = inlined_call_operand.hbm [shape: f32[8,128], index: 1, kind: input, shape index: {}]   ;;  %s845_s2 = inlined_call_operand.hbm [shape: f32[4,128], index: 2, kind: output, shape index: {}]  }
   0x1   :  { %8 = vsyncpa [#allocation6], 0 }
   0x2   :  { %9 = vsyncpa [#allocation4], 0  ;;  %s754_s9 = smov [#allocation2]   ;;  %s755_s11 = smov [#allocation5]  }
   0x3   :  { %s16_s10 = sshll.u32 %s754_s9, 4  ;;  %s26_s12 = sshll.u32 %s755_s11, 4  ;;  %s17_s10 = int_to_ptr.vmem [resolvable:$true] %s16_s10  ;;  %s27_s12 = int_to_ptr.vmem [resolvable:$true] %s26_s12 }
   0x4   :  { %s682_s15 = scalar_lea.hbm %s843_s0, 64 }
   0x5   :  { %p683_p0 = scmp.ne.s32.totalorder %s843_s0, %s682_s15  ;;  %p686_p1 = scmp.lt.u32.totalorder %s682_s15, %s843_s0 }
   0x7   :  { %p688_p2 = pnand %p686_p1, %p683_p0 }
   0x9   :  { %691 = shalt.err (!%p688_p2)
}
   0xa   :  { %s692_s20 = scalar_lea.vmem %s17_s10, 64  ;;  %p697_p4 = scmp.lt.s32.totalorder %s17_s10, %s17_s10 }
   0xb   :  { %p693_p3 = scmp.ne.s32.totalorder %s17_s10, %s692_s20  ;;  %p698_p5 = scmp.lt.s32.totalorder %s692_s20, %s692_s20 }
   0xd   :  { %p699_p6 = por %p698_p5, %p697_p4 }
   0xf   :  { %p700_p7 = pnand %p699_p6, %p693_p3 }
  0x11   :  { %703 = shalt.err (!%p700_p7)
}
  0x12   :  { %19 = dma.hbm_to_vmem [thread:$0]  %s843_s0, 64, %s17_s10, [#allocation3]  }
  0x13   :  { %s704_s25 = scalar_lea.hbm %s844_s1, 128 }
  0x14   :  { %p705_p8 = scmp.ne.s32.totalorder %s844_s1, %s704_s25  ;;  %p708_p9 = scmp.lt.u32.totalorder %s704_s25, %s844_s1 }
  0x16   :  { %p710_p10 = pnand %p708_p9, %p705_p8 }
  0x18   :  { %713 = shalt.err (!%p710_p10)
}
  0x19   :  { %s714_s30 = scalar_lea.vmem %s27_s12, 128  ;;  %p719_p12 = scmp.lt.s32.totalorder %s27_s12, %s27_s12 }
  0x1a   :  { %p715_p11 = scmp.ne.s32.totalorder %s27_s12, %s714_s30  ;;  %p720_p13 = scmp.lt.s32.totalorder %s714_s30, %s714_s30 }
  0x1c   :  { %p721_p0 = por %p720_p13, %p719_p12 }
  0x1e   :  { %p722_p1 = pnand %p721_p0, %p715_p11 }
  0x20   :  { %725 = shalt.err (!%p722_p1)
}
  0x21   :  { %29 = dma.hbm_to_vmem [thread:$0]  %s844_s1, 128, %s27_s12, [#allocation6]  }
  0x22   :  { %748 = dma.done.wait [#allocation3], 64  }
  0x23   :  { %749 = vsyncadd [#allocation3], 4294967232 }
  0x24   :  { %750 = dma.done.wait [#allocation6], 128  }
  0x25   :  { %751 = vsyncadd [#allocation6], 4294967168  ;;  %v756_v0 = vmov 0.0   ;;  %vm757_vm0 = vmmov 0   ;;  %vm38_vm1 = vcmask 64512   ;;  %v37_v1 = vld [vmem:[#allocation5] sm:$0xff] }
  0x26   :  { %639 = vmatprep.subr.mxu0 %v756_v0  ;;  %641 = vmatprep.mubr.msk.f32.mxu0 %vm757_vm0, %v756_v0  ;;  %v36_v2 = vld [vmem:[#allocation2] sm:$0xf]  ;;  %v43_v3 = vand.u32 4294901760, %v37_v1  ;;  %v758_v29 = vmov 683565275   ;;  %s764_s1 = smov [#allocation7]  }
  0x27   :  { %624 = vmatprep.subr.mxu1 %v756_v0  ;;  %626 = vmatprep.mubr.msk.f32.mxu1 %vm757_vm0, %v756_v0  ;;  %v40_v4 = vsel %vm38_vm1, %v36_v2, 0  ;;  %v759_v31 = vmov 2475754826   ;;  %v760_v34 = vmov 2131351028   ;;  %s598_s4 = sshll.u32 %s764_s1, 4  ;;  %s599_s4 = int_to_ptr.vmem [resolvable:$true] %s598_s4 }
  0x28   :  { %v108_v5 = vand.u32 4294901760, %v40_v4  ;;  %v120_v6 = vsub.f32 %v37_v1, %v43_v3  ;;  %640 = vmatpush3.msra.mxu0 %v43_v3  ;;  %625 = vmatpush3.msra.mxu1 %v43_v3  ;;  %v761_v37 = vmov 2102212464   ;;  %v762_v40 = vmov 920167782   ;;  %s726_s5 = scalar_lea.vmem %s599_s4, 64  ;;  %p731_p3 = scmp.lt.s32.totalorder %s599_s4, %s599_s4 }
  0x29   :  { %629 = vmatprep.subr.mxu1 %v756_v0  ;;  %644 = vmatprep.subr.mxu0 %v756_v0  ;;  %v763_v43 = vmov 1326507024   ;;  %p727_p2 = scmp.ne.s32.totalorder %s599_s4, %s726_s5  ;;  %p732_p4 = scmp.lt.s32.totalorder %s726_s5, %s726_s5 }
  0x2a   :  { %v109_v7 = vsub.f32 %v40_v4, %v108_v5  ;;  %v121_v8 = vand.u32 4294901760, %v120_v6 }
  0x2b   :  { %p733_p5 = por %p732_p4, %p731_p3 }
  0x2c   :  { %v110_v9 = vand.u32 4294901760, %v109_v7  ;;  %v122_v10 = vsub.f32 %v120_v6, %v121_v8 }
  0x2d   :  { %p734_p6 = pnand %p733_p5, %p727_p2 }
  0x2e   :  { %642 = vmatmul.mubr.f32.vlgmr.msra.gmra.mrb[0].mxu0 %v110_v9  ;;  %v111_v11 = vsub.f32 %v109_v7, %v110_v9  ;;  %v123_v12 = vand.u32 4294901760, %v122_v10 }
  0x2f   :  { %645 = vmatpush3.msra.mxu0 %v121_v8  ;;  %646 = vmatprep.mubr.msk.f32.mxu0 %vm757_vm0, %v756_v0 }
  0x30   :  { %v112_v13 = vand.u32 4294901760, %v111_v11  ;;  %649 = vmatprep.subr.mxu0 %v756_v0 }
  0x32   :  { %627 = vmatmul.mubr.f32.vlgmr.msra.gmra.mrb[0].mxu1 %v112_v13 }
  0x33   :  { %630 = vmatpush3.msra.mxu1 %v123_v12  ;;  %631 = vmatprep.mubr.msk.f32.mxu1 %vm757_vm0, %v756_v0 }
  0x34   :  { %634 = vmatprep.subr.mxu1 %v756_v0 }
  0x36   :  { %647 = vmatmul.mubr.f32.vlgmr.msra.gmra.mrb[0].mxu0 %v108_v5 }
  0x37   :  { %650 = vmatpush3.msra.mxu0 %v43_v3  ;;  %651 = vmatprep.mubr.msk.f32.mxu0 %vm757_vm0, %v756_v0 }
  0x3a   :  { %632 = vmatmul.mubr.f32.vlgmr.msra.gmra.mrb[0].mxu1 %v108_v5 }
  0x3b   :  { %635 = vmatpush3.msra.mxu1 %v120_v6  ;;  %636 = vmatprep.mubr.msk.f32.mxu1 %vm757_vm0, %v756_v0 }
  0x3e   :  { %652 = vmatmul.mubr.f32.vlgmr.msra.gmra.mrb[0].mxu0 %v108_v5 }
  0x42   :  { %637 = vmatmul.mubr.f32.vlgmr.msra.gmra.mrb[0].mxu1 %v109_v7 }
 0x111   :  { %v484_v14 = vpop.f32.mrb[0].mxu0 }
 0x112   :  { %v653_v15 = vpop.f32.mrb[1].mxu0 }
 0x115   :  { %v264_v16 = vpop.f32.mrb[0].mxu1 }
 0x116   :  { %v810_v17 = vadd.f32 %v484_v14, %v264_v16  ;;  %v638_v18 = vpop.f32.mrb[1].mxu1 }
 0x118   :  { %v491_v19 = vand.u32 2139095040, %v810_v17  ;;  %v488_v23 = vand.u32 2147483647, %v810_v17  ;;  %vm490_vm9 = vcmp.lt.s32.totalorder %v810_v17, 0  ;;  %vm580_vm14 = vweird.f32 %v810_v17 }
 0x11a   :  { %v492_v20 = vshrl.u32 %v491_v19, 23  ;;  %v495_v26 = vand.u32 8388607, %v488_v23  ;;  %vm489_vm10 = vcmp.le.f32.partialorder %v488_v23, 0.7853982 }
 0x11c   :  { %v608_v21 = vadd.s32 4294967169, %v492_v20  ;;  %v496_v45 = vor.u32 8388608, %v495_v26 }
 0x11e   :  { %v498_v22 = vadd.s32 1, %v608_v21  ;;  %v536_v59 = vshll.u32 %v496_v45, 8 }
 0x120   :  { %vm499_vm2 = vcmp.gt.s32.totalorder %v498_v22, 0 }
 0x121   :  { %v500_v24 = vsel %vm499_vm2, %v498_v22, 0 }
 0x122   :  { %v502_v25 = vand.u32 31, %v500_v24  ;;  %v501_v28 = vshrl.u32 %v500_v24, 5 }
 0x124   :  { %v503_v27 = vsub.s32 32, %v502_v25  ;;  %v505_v30 = vshll.u32 %v758_v29, %v502_v25  ;;  %v508_v32 = vshll.u32 %v759_v31, %v502_v25  ;;  %v511_v36 = vshll.u32 %v760_v34, %v502_v25 }
 0x125   :  { %v514_v39 = vshll.u32 %v761_v37, %v502_v25  ;;  %v517_v42 = vshll.u32 %v762_v40, %v502_v25  ;;  %vm520_vm3 = vcmp.lt.s32.totalorder %v501_v28, 1  ;;  %vm523_vm4 = vcmp.lt.s32.totalorder %v501_v28, 4 }
 0x126   :  { %v506_v33 = vshrl.u32 %v759_v31, %v503_v27  ;;  %v509_v35 = vshrl.u32 %v760_v34, %v503_v27  ;;  %v512_v38 = vshrl.u32 %v761_v37, %v503_v27  ;;  %v515_v41 = vshrl.u32 %v762_v40, %v503_v27 }
 0x127   :  { %v518_v44 = vshrl.u32 %v763_v43, %v503_v27  ;;  %v504_v54 = vshrl.u32 %v758_v29, %v503_v27  ;;  %vm522_vm5 = vcmp.lt.s32.totalorder %v501_v28, 3  ;;  %vm521_vm6 = vcmp.lt.s32.totalorder %v501_v28, 2 }
 0x128   :  { %v507_v46 = vor.u32 %v506_v33, %v505_v30  ;;  %v510_v47 = vor.u32 %v509_v35, %v508_v32  ;;  %v513_v48 = vor.u32 %v512_v38, %v511_v36  ;;  %v516_v49 = vor.u32 %v515_v41, %v514_v39 }
 0x129   :  { %v519_v50 = vor.u32 %v518_v44, %v517_v42 }
 0x12a   :  { %v525_v51 = vsel %vm523_vm4, %v513_v48, 2102212464  ;;  %v528_v52 = vsel %vm520_vm3, %v507_v46, %v510_v47  ;;  %v532_v53 = vsel %vm520_vm3, %v510_v47, %v513_v48  ;;  %v529_v55 = vsel %vm523_vm4, %v516_v49, 920167782 }
 0x12b   :  { %v533_v56 = vsel %vm523_vm4, %v519_v50, 1326507024  ;;  %v530_v57 = vsel %vm522_vm5, %v513_v48, %v529_v55  ;;  %v524_v60 = vsel %vm520_vm3, %v504_v54, %v507_v46  ;;  %v526_v61 = vsel %vm522_vm5, %v510_v47, %v525_v51 }
 0x12c   :  { %v534_v58 = vsel %vm522_vm5, %v516_v49, %v533_v56  ;;  %v531_v62 = vsel %vm521_vm6, %v528_v52, %v530_v57  ;;  %v527_v4 = vsel %vm521_vm6, %v524_v60, %v526_v61 }
 0x12d   :  { %v535_v63 = vsel %vm521_vm6, %v532_v53, %v534_v58  ;;  %v819_v2 = vmul.u32.u64.low %v536_v59, %v531_v62  ;;  %v820_v3 = vmul.u32.u64.high %v536_v59, %v531_v62, %v819_v2  ;;  %v543_v6 = vmul.u32 %v536_v59, %v527_v4 }
 0x12e   :  { %v816_v0 = vmul.u32.u64.low %v536_v59, %v535_v63  ;;  %v817_v1 = vmul.u32.u64.high %v536_v59, %v535_v63, %v816_v0 }
 0x12f   :  { %v546_v5 = vadd.s32 1, %v820_v3 }
 0x130   :  { %vm545_vm7 = vc.u32 %v817_v1, %v819_v2  ;;  %v544_v19 = vadd.s32 %v819_v2, %v817_v1 }
 0x131   :  { %v547_v7 = vsel %vm545_vm7, %v546_v5, %v820_v3 }
 0x132   :  { %v548_v8 = vadd.s32 %v547_v7, %v543_v6 }
 0x134   :  { %v549_v9 = vadd.s32 536870912, %v548_v8 }
 0x136   :  { %v550_v10 = vshrl.u32 %v549_v9, 30 }
 0x138   :  { %v551_v11 = vshll.u32 %v550_v10, 30  ;;  %v574_v34 = vsub.s32 4, %v550_v10 }
 0x13a   :  { %v552_v12 = vsub.s32 %v548_v8, %v551_v11  ;;  %v575_v36 = vsel %vm490_vm9, %v574_v34, %v550_v10 }
 0x13b   :  { %v577_v37 = vsel %vm489_vm10, 0, %v575_v36 }
 0x13c   :  { %v554_v13 = vsub.s32 0, %v552_v12  ;;  %v581_v38 = vand.u32 3, %v577_v37 }
 0x13e   :  { %v609_v14 = vmin.u32 %v554_v13, %v552_v12  ;;  %vm586_vm11 = vcmp.eq.s32.totalorder %v581_v38, 2  ;;  %vm583_vm12 = vcmp.eq.s32.totalorder %v581_v38, 0  ;;  %vm582_vm13 = vcmp.lt.s32.totalorder %v581_v38, 2 }
 0x140   :  { %v556_v15 = vclz %v609_v14 }
 0x142   :  { %v610_v16 = vadd.s32 4294967294, %v556_v15 }
 0x144   :  { %vm611_vm8 = vcmp.lt.s32.totalorder %v610_v16, 0 }
 0x145   :  { %v559_v18 = vsel %vm611_vm8, 0, %v610_v16 }
 0x146   :  { %v560_v20 = vsub.s32 32, %v559_v18  ;;  %v564_v21 = vsub.s32 4294967266, %v559_v18  ;;  %v561_v22 = vshll.u32 %v552_v12, %v559_v18 }
 0x148   :  { %v562_v24 = vshrl.u32 %v544_v19, %v560_v20  ;;  %v565_v25 = vadd.s32 127, %v564_v21 }
 0x14a   :  { %v563_v26 = vor.u32 %v562_v24, %v561_v22  ;;  %v566_v27 = vshll.u32 %v565_v25, 23 }
 0x14c   :  { %v567_v28 = vor.u32 4788187, %v566_v27  ;;  %v570_v30 = vcvt.s32.f32 %v563_v26 }
 0x14e   :  { %v568_v29 = vand.u32 2147483647, %v567_v28 }
 0x150   :  { %v571_v31 = vmul.f32 %v570_v30, %v568_v29 }
 0x152   :  { %v572_v32 = vxor.u32 2147483648, %v571_v31 }
 0x154   :  { %v573_v33 = vsel %vm490_vm9, %v572_v32, %v571_v31 }
 0x155   :  { %v576_v35 = vsel %vm489_vm10, %v810_v17, %v573_v33 }
 0x156   :  { %678 = vcosq.f32 %v576_v35 }
 0x157   :  { %680 = vsinq.f32 %v576_v35 }
 0x160   :  { %v679_v39 = vpop.eup %678 }
 0x161   :  { %v681_v40 = vpop.eup %680  ;;  %v587_v41 = vxor.u32 2147483648, %v679_v39 }
 0x162   :  { %v584_v42 = vxor.u32 2147483648, %v681_v40 }
 0x163   :  { %v588_v43 = vsel %vm586_vm11, %v587_v41, %v681_v40 }
 0x164   :  { %v585_v44 = vsel %vm583_vm12, %v679_v39, %v584_v42 }
 0x165   :  { %v589_v23 = vsel %vm582_vm13, %v585_v44, %v588_v43 }
 0x166   :  { %v590_v45 = vsel %vm580_vm14, nan, %v589_v23 }
 0x167   :  { %591 = vst [vmem:[#allocation7] sm:$0xf] %v590_v45 }
 0x168   :  { %737 = shalt.err (!%p734_p6)
}
 0x169   :  { %s738_s8 = scalar_lea.hbm %s845_s2, 64 }
 0x16a   :  { %p739_p7 = scmp.ne.s32.totalorder %s845_s2, %s738_s8  ;;  %p742_p8 = scmp.lt.u32.totalorder %s738_s8, %s845_s2 }
 0x16c   :  { %p744_p9 = pnand %p742_p8, %p739_p7 }
 0x16e   :  { %747 = shalt.err (!%p744_p9)
}
 0x16f   :  { %601 = dma.vmem_to_hbm [thread:$0]  %s599_s4, 64, %s845_s2, [#allocation4]  }
 0x170   :  { %752 = dma.done.wait [#allocation4], 64  }
 0x171   :  { %753 = vsyncadd [#allocation4], 4294967232 }
 0x172   :  { %605 = vsyncpa [#allocation3], 1 }
 0x173   :  { %606 = vsyncpa [#allocation6], 1 }
 0x174   :  { %607 = vsyncpa [#allocation4], 1 }

</bundles_post_ra>
